<compile_context>
chip_gen: v7x
topology: tpu7x:2x2x1
jax: 0.10.0
libtpu: 0.0.40
codegen_flags: <defaults>
</compile_context>

<pallas_src>
import functools

import jax
import jax.numpy as jnp
from jax import lax
from jax.experimental import pallas as pl
from jax.experimental.pallas import tpu as pltpu


def _shapelet_kernel(x_ref, w_ref, maxp_ref, mind_ref, *,
                     length, stride, eps, num_windows, num_shapelets,
                     chunk, n_chunks, unroll_chunks, diff_dtype):
    """One batch block.

    x_ref   : (bt, M, T)     input series rows for this grid step
    w_ref   : (N*M, L)       flattened shapelet bank (grid-invariant, tiny)
    maxp_ref: (bt, 1, N*M)   max_t exp(-(eps*d)^2)
    mind_ref: (bt, 1, N*M)   min_t d
    """
    M = x_ref.shape[1]
    N = num_shapelets

    # Pack `g` shapelets per accumulator group so all 8 sublanes are live while
    # x only has to be replicated g times per slab (g = 2 for M = 4).
    g = max(1, 8 // M) if M < 8 else 1
    groups = [(s, min(g, N - s)) for s in range(0, N, g)]  # (first shapelet, count)

    w = w_ref[...].astype(diff_dtype)                      # (N*M, L)
    # Hoist the per-(group, offset) shapelet columns out of the chunk / l loops.
    w_cols = [[w[s * M:(s + c) * M, l:l + 1][None]         # each (1, c*M, 1)
               for l in range(length)]
              for (s, c) in groups]

    def chunk_min(w_off):
        """min over `chunk` windows starting at window index `w_off` of
        sum_l |x[.., t*stride + l] - w[.., l]|, flattened to (bt, N*M)."""
        accs = [None] * len(groups)
        for l in range(length):
            start = w_off * stride + l
            if stride == 1:
                xs = x_ref[:, :, pl.ds(start, chunk)]               # (bt, M, chunk)
            else:
                # TODO(synk): strided lane load for stride > 1; not exercised below.
                xs = x_ref[:, :, pl.ds(start, chunk, stride=stride)]
            xs = xs.astype(diff_dtype)

            def rep(k):  # replicate channels across k shapelets (sublane axis)
                return xs if k == 1 else jnp.concatenate([xs] * k, axis=1)

            xs_g = rep(g)                                           # (bt, g*M, chunk)
            for gi, (s, c) in enumerate(groups):
                xg = xs_g if c == g else rep(c)
                d = jnp.abs(xg - w_cols[gi][l])                     # (bt, c*M, chunk)
                accs[gi] = d if accs[gi] is None else accs[gi] + d
        # One cross-lane (XLU) min per group, then lay the groups out on lanes so
        # the flattened order is n*M + m (matches the module's flatten(start_dim=1)).
        mins = [jnp.min(a, axis=-1) for a in accs]                  # each (bt, c*M)
        return jnp.concatenate(mins, axis=-1).astype(jnp.float32)   # (bt, N*M)

    if n_chunks == 1:
        running = chunk_min(0)
    elif unroll_chunks:
        running = chunk_min(0)
        for i in range(1, n_chunks):
            w_off = min(i * chunk, num_windows - chunk)             # static clamp
            running = jnp.minimum(running, chunk_min(w_off))
    else:
        def body(i, carry):
            w_off = jnp.minimum(i * chunk, num_windows - chunk)     # clamped tail
            return jnp.minimum(carry, chunk_min(w_off))
        running = lax.fori_loop(1, n_chunks, body, chunk_min(0))

    # Exact: max_t exp(-(eps*d_t)^2) == exp(-(eps * min_t d_t)^2) since d_t >= 0.
    min_d = running * (1.0 / length)                                # sum_l -> mean_l
    scaled = min_d if eps == 1.0 else min_d * eps
    maxp_ref[...] = jnp.exp(-(scaled * scaled))[:, None, :]
    mind_ref[...] = min_d[:, None, :]


_VREG_BUDGET = 40  # accumulator vregs allowed per chunk (64-entry vreg file)


def _derive_bt(B, M, T, NM, chunk, block_b):
    sub_groups = pl.cdiv(NM, 8)
    lane_groups = pl.cdiv(chunk, 128)
    bt_vreg = max(1, _VREG_BUDGET // (sub_groups * lane_groups))
    # Keep the double-buffered x block around ~8 MiB (v7x has 64 MiB VMEM total).
    x_row_bytes = pl.cdiv(M, 8) * 8 * pl.cdiv(T, 128) * 128 * 4
    bt_vmem = max(1, (8 << 20) // (2 * x_row_bytes))
    if block_b is not None:
        return max(1, min(block_b, bt_vreg, bt_vmem, B))
    # Auto: also keep >= ~4 grid blocks when B allows, so both v7x TensorCores
    # and the DMA pipeline stay busy.
    return max(1, min(8, bt_vreg, bt_vmem, max(1, pl.cdiv(B, 4)), B))


def shapelet_forward(x, weights, *, length, stride=1, eps=1.0,
                     block_b=None, window_chunk=None, diff_dtype=jnp.float32):
    """Pallas forward.  x: (B, M, T), weights: (N, M, L) -> two (B, N*M) arrays."""
    assert x.ndim == 3 and weights.ndim == 3
    B, M, T = x.shape
    N, Mw, L = weights.shape
    assert Mw == M and L == length
    num_windows = (T - length) // stride + 1
    assert num_windows >= 1
    NM = N * M

    chunk = min(window_chunk if window_chunk is not None else 256, num_windows)
    chunk = max(1, chunk)
    n_chunks = pl.cdiv(num_windows, chunk)
    unroll_chunks = n_chunks <= 4

    bt = _derive_bt(B, M, T, NM, chunk, block_b)
    grid_b = pl.cdiv(B, bt)

    w_flat = weights.reshape(NM, L).astype(jnp.float32)   # row j = n*M + m

    kernel = functools.partial(
        _shapelet_kernel, length=length, stride=stride, eps=float(eps),
        num_windows=num_windows, num_shapelets=N, chunk=chunk,
        n_chunks=n_chunks, unroll_chunks=unroll_chunks,
        diff_dtype=jnp.dtype(diff_dtype))

    max_p, min_d = pl.pallas_call(
        kernel,
        out_shape=(jax.ShapeDtypeStruct((B, 1, NM), jnp.float32),
                   jax.ShapeDtypeStruct((B, 1, NM), jnp.float32)),
        grid_spec=pltpu.PrefetchScalarGridSpec(
            num_scalar_prefetch=0,
            grid=(grid_b,),
            in_specs=[
                pl.BlockSpec((bt, M, T), lambda b: (b, 0, 0)),   # batch block of x
                pl.BlockSpec((NM, L), lambda b: (0, 0)),         # full shapelet bank
            ],
            out_specs=[
                pl.BlockSpec((bt, 1, NM), lambda b: (b, 0, 0)),
                pl.BlockSpec((bt, 1, NM), lambda b: (b, 0, 0)),
            ],
        ),
        compiler_params=pltpu.CompilerParams(
            dimension_semantics=("parallel",),
            vmem_limit_bytes=32 * 1024 * 1024,
        ),
    )(x.astype(jnp.float32), w_flat)

    # (B, 1, N*M) -> (B, N*M): metadata-only reshape.
    return max_p.reshape(B, NM), min_d.reshape(B, NM)


def shapelet_reference(x, weights, *, length, stride=1, eps=1.0):
    """Pure-JAX reference mirroring the PyTorch forward (abs-mean distance path)."""
    B, M, T = x.shape
    nw = (T - length) // stride + 1
    windows = jnp.stack(
        [x[:, :, t * stride:t * stride + length] for t in range(nw)], axis=2
    )                                                          # (B, M, t, L) == unfold
    xw = jnp.transpose(windows, (0, 2, 1, 3))[:, :, None]      # (B, t, 1, M, L)
    d = jnp.mean(jnp.abs(xw - weights[None, None]), axis=-1)   # (B, t, N, M)
    p = jnp.exp(-jnp.square(eps * d))
    max_p = jnp.max(p, axis=1)                                 # straight-through value
    min_d = jnp.min(d, axis=1)
    return max_p.reshape(B, -1), min_d.reshape(B, -1)


if __name__ == "__main__":
    # Shapes consistent with the module:
    #   dim_data=4, shapelet_len=8, num_shapelet=10, stride=1, eps=1.0
    #   x: (batch, dim_data=4, T=16) -> 9 windows, outputs (batch, 40)
    M, T, N, L = 4, 16, 10, 8

    root = jax.random.PRNGKey(0)
    kx, kw, kx2 = jax.random.split(root, 3)
    weights = jax.random.normal(kw, (N, M, L), dtype=jnp.float32)

    def check(x_in, **kwargs):
        mp, md = shapelet_forward(x_in, weights, length=L, **kwargs)
        mp = jax.block_until_ready(mp)
        md = jax.block_until_ready(md)
        rp, rd = shapelet_reference(x_in, weights, length=L)
        assert mp.shape == rp.shape and md.shape == rd.shape
        assert jnp.allclose(mp, rp, atol=1e-5, rtol=1e-5), "max_p mismatch"
        assert jnp.allclose(md, rd, atol=1e-5, rtol=1e-5), "min_d mismatch"

    x = jax.random.normal(kx, (2, M, T), dtype=jnp.float32)

    check(x)                      # single window chunk (default path)
    check(x, window_chunk=4)      # 3 chunks: static-unrolled running min, clamped tail
    check(x, window_chunk=2)      # 5 chunks: lax.fori_loop running-min path

    # Ragged batch tail: B=5 with bt=2 -> last grid block is half padding.
    x5 = jax.random.normal(kx2, (5, M, T), dtype=jnp.float32)
    check(x5, block_b=2)

    print("KERNEL_OK")
</pallas_src>

<mosaic_0001>
module attributes {stable_mosaic.version = 11 : i64} {
  func.func @_shapelet_kernel(%arg0: i32, %arg1: memref<1x4x16xf32, #tpu.memory_space<vmem>>, %arg2: memref<40x8xf32, #tpu.memory_space<vmem>>, %arg3: memref<1x1x40xf32, #tpu.memory_space<vmem>>, %arg4: memref<1x1x40xf32, #tpu.memory_space<vmem>>) attributes {dimension_semantics = [#tpu.dimension_semantics<parallel>], iteration_bounds = array<i64: 2>, scalar_prefetch = 0 : i64, scratch_operands = 0 : i64, tpu.core_type = #tpu.core_type<tc>, window_params = [{transform_indices = @transform_0, window_bounds = array<i64: 1, 4, 16>}, {pipeline_mode = #tpu.pipeline_mode<synchronous>, transform_indices = @transform_1, window_bounds = array<i64: 40, 8>}, {transform_indices = @transform_2, window_bounds = array<i64: 1, 1, 40>}, {transform_indices = @transform_3, window_bounds = array<i64: 1, 1, 40>}]} {
    %c0 = arith.constant 0 : index
    %c0_0 = arith.constant 0 : index
    %0 = vector.load %arg2[%c0, %c0_0] : memref<40x8xf32, #tpu.memory_space<vmem>>, vector<40x8xf32>
    %1 = vector.extract_strided_slice %0 {offsets = [0, 0], sizes = [8, 1], strides = [1, 1]} : vector<40x8xf32> to vector<8x1xf32>
    %2 = vector.shape_cast %1 : vector<8x1xf32> to vector<1x8x1xf32>
    %3 = vector.extract_strided_slice %0 {offsets = [0, 1], sizes = [8, 1], strides = [1, 1]} : vector<40x8xf32> to vector<8x1xf32>
    %4 = vector.shape_cast %3 : vector<8x1xf32> to vector<1x8x1xf32>
    %5 = vector.extract_strided_slice %0 {offsets = [0, 2], sizes = [8, 1], strides = [1, 1]} : vector<40x8xf32> to vector<8x1xf32>
    %6 = vector.shape_cast %5 : vector<8x1xf32> to vector<1x8x1xf32>
    %7 = vector.extract_strided_slice %0 {offsets = [0, 3], sizes = [8, 1], strides = [1, 1]} : vector<40x8xf32> to vector<8x1xf32>
    %8 = vector.shape_cast %7 : vector<8x1xf32> to vector<1x8x1xf32>
    %9 = vector.extract_strided_slice %0 {offsets = [0, 4], sizes = [8, 1], strides = [1, 1]} : vector<40x8xf32> to vector<8x1xf32>
    %10 = vector.shape_cast %9 : vector<8x1xf32> to vector<1x8x1xf32>
    %11 = vector.extract_strided_slice %0 {offsets = [0, 5], sizes = [8, 1], strides = [1, 1]} : vector<40x8xf32> to vector<8x1xf32>
    %12 = vector.shape_cast %11 : vector<8x1xf32> to vector<1x8x1xf32>
    %13 = vector.extract_strided_slice %0 {offsets = [0, 6], sizes = [8, 1], strides = [1, 1]} : vector<40x8xf32> to vector<8x1xf32>
    %14 = vector.shape_cast %13 : vector<8x1xf32> to vector<1x8x1xf32>
    %15 = vector.extract_strided_slice %0 {offsets = [0, 7], sizes = [8, 1], strides = [1, 1]} : vector<40x8xf32> to vector<8x1xf32>
    %16 = vector.shape_cast %15 : vector<8x1xf32> to vector<1x8x1xf32>
    %17 = vector.extract_strided_slice %0 {offsets = [8, 0], sizes = [8, 1], strides = [1, 1]} : vector<40x8xf32> to vector<8x1xf32>
    %18 = vector.shape_cast %17 : vector<8x1xf32> to vector<1x8x1xf32>
    %19 = vector.extract_strided_slice %0 {offsets = [8, 1], sizes = [8, 1], strides = [1, 1]} : vector<40x8xf32> to vector<8x1xf32>
    %20 = vector.shape_cast %19 : vector<8x1xf32> to vector<1x8x1xf32>
    %21 = vector.extract_strided_slice %0 {offsets = [8, 2], sizes = [8, 1], strides = [1, 1]} : vector<40x8xf32> to vector<8x1xf32>
    %22 = vector.shape_cast %21 : vector<8x1xf32> to vector<1x8x1xf32>
    %23 = vector.extract_strided_slice %0 {offsets = [8, 3], sizes = [8, 1], strides = [1, 1]} : vector<40x8xf32> to vector<8x1xf32>
    %24 = vector.shape_cast %23 : vector<8x1xf32> to vector<1x8x1xf32>
    %25 = vector.extract_strided_slice %0 {offsets = [8, 4], sizes = [8, 1], strides = [1, 1]} : vector<40x8xf32> to vector<8x1xf32>
    %26 = vector.shape_cast %25 : vector<8x1xf32> to vector<1x8x1xf32>
    %27 = vector.extract_strided_slice %0 {offsets = [8, 5], sizes = [8, 1], strides = [1, 1]} : vector<40x8xf32> to vector<8x1xf32>
    %28 = vector.shape_cast %27 : vector<8x1xf32> to vector<1x8x1xf32>
    %29 = vector.extract_strided_slice %0 {offsets = [8, 6], sizes = [8, 1], strides = [1, 1]} : vector<40x8xf32> to vector<8x1xf32>
    %30 = vector.shape_cast %29 : vector<8x1xf32> to vector<1x8x1xf32>
    %31 = vector.extract_strided_slice %0 {offsets = [8, 7], sizes = [8, 1], strides = [1, 1]} : vector<40x8xf32> to vector<8x1xf32>
    %32 = vector.shape_cast %31 : vector<8x1xf32> to vector<1x8x1xf32>
    %33 = vector.extract_strided_slice %0 {offsets = [16, 0], sizes = [8, 1], strides = [1, 1]} : vector<40x8xf32> to vector<8x1xf32>
    %34 = vector.shape_cast %33 : vector<8x1xf32> to vector<1x8x1xf32>
    %35 = vector.extract_strided_slice %0 {offsets = [16, 1], sizes = [8, 1], strides = [1, 1]} : vector<40x8xf32> to vector<8x1xf32>
    %36 = vector.shape_cast %35 : vector<8x1xf32> to vector<1x8x1xf32>
    %37 = vector.extract_strided_slice %0 {offsets = [16, 2], sizes = [8, 1], strides = [1, 1]} : vector<40x8xf32> to vector<8x1xf32>
    %38 = vector.shape_cast %37 : vector<8x1xf32> to vector<1x8x1xf32>
    %39 = vector.extract_strided_slice %0 {offsets = [16, 3], sizes = [8, 1], strides = [1, 1]} : vector<40x8xf32> to vector<8x1xf32>
    %40 = vector.shape_cast %39 : vector<8x1xf32> to vector<1x8x1xf32>
    %41 = vector.extract_strided_slice %0 {offsets = [16, 4], sizes = [8, 1], strides = [1, 1]} : vector<40x8xf32> to vector<8x1xf32>
    %42 = vector.shape_cast %41 : vector<8x1xf32> to vector<1x8x1xf32>
    %43 = vector.extract_strided_slice %0 {offsets = [16, 5], sizes = [8, 1], strides = [1, 1]} : vector<40x8xf32> to vector<8x1xf32>
    %44 = vector.shape_cast %43 : vector<8x1xf32> to vector<1x8x1xf32>
    %45 = vector.extract_strided_slice %0 {offsets = [16, 6], sizes = [8, 1], strides = [1, 1]} : vector<40x8xf32> to vector<8x1xf32>
    %46 = vector.shape_cast %45 : vector<8x1xf32> to vector<1x8x1xf32>
    %47 = vector.extract_strided_slice %0 {offsets = [16, 7], sizes = [8, 1], strides = [1, 1]} : vector<40x8xf32> to vector<8x1xf32>
    %48 = vector.shape_cast %47 : vector<8x1xf32> to vector<1x8x1xf32>
    %49 = vector.extract_strided_slice %0 {offsets = [24, 0], sizes = [8, 1], strides = [1, 1]} : vector<40x8xf32> to vector<8x1xf32>
    %50 = vector.shape_cast %49 : vector<8x1xf32> to vector<1x8x1xf32>
    %51 = vector.extract_strided_slice %0 {offsets = [24, 1], sizes = [8, 1], strides = [1, 1]} : vector<40x8xf32> to vector<8x1xf32>
    %52 = vector.shape_cast %51 : vector<8x1xf32> to vector<1x8x1xf32>
    %53 = vector.extract_strided_slice %0 {offsets = [24, 2], sizes = [8, 1], strides = [1, 1]} : vector<40x8xf32> to vector<8x1xf32>
    %54 = vector.shape_cast %53 : vector<8x1xf32> to vector<1x8x1xf32>
    %55 = vector.extract_strided_slice %0 {offsets = [24, 3], sizes = [8, 1], strides = [1, 1]} : vector<40x8xf32> to vector<8x1xf32>
    %56 = vector.shape_cast %55 : vector<8x1xf32> to vector<1x8x1xf32>
    %57 = vector.extract_strided_slice %0 {offsets = [24, 4], sizes = [8, 1], strides = [1, 1]} : vector<40x8xf32> to vector<8x1xf32>
    %58 = vector.shape_cast %57 : vector<8x1xf32> to vector<1x8x1xf32>
    %59 = vector.extract_strided_slice %0 {offsets = [24, 5], sizes = [8, 1], strides = [1, 1]} : vector<40x8xf32> to vector<8x1xf32>
    %60 = vector.shape_cast %59 : vector<8x1xf32> to vector<1x8x1xf32>
    %61 = vector.extract_strided_slice %0 {offsets = [24, 6], sizes = [8, 1], strides = [1, 1]} : vector<40x8xf32> to vector<8x1xf32>
    %62 = vector.shape_cast %61 : vector<8x1xf32> to vector<1x8x1xf32>
    %63 = vector.extract_strided_slice %0 {offsets = [24, 7], sizes = [8, 1], strides = [1, 1]} : vector<40x8xf32> to vector<8x1xf32>
    %64 = vector.shape_cast %63 : vector<8x1xf32> to vector<1x8x1xf32>
    %65 = vector.extract_strided_slice %0 {offsets = [32, 0], sizes = [8, 1], strides = [1, 1]} : vector<40x8xf32> to vector<8x1xf32>
    %66 = vector.shape_cast %65 : vector<8x1xf32> to vector<1x8x1xf32>
    %67 = vector.extract_strided_slice %0 {offsets = [32, 1], sizes = [8, 1], strides = [1, 1]} : vector<40x8xf32> to vector<8x1xf32>
    %68 = vector.shape_cast %67 : vector<8x1xf32> to vector<1x8x1xf32>
    %69 = vector.extract_strided_slice %0 {offsets = [32, 2], sizes = [8, 1], strides = [1, 1]} : vector<40x8xf32> to vector<8x1xf32>
    %70 = vector.shape_cast %69 : vector<8x1xf32> to vector<1x8x1xf32>
    %71 = vector.extract_strided_slice %0 {offsets = [32, 3], sizes = [8, 1], strides = [1, 1]} : vector<40x8xf32> to vector<8x1xf32>
    %72 = vector.shape_cast %71 : vector<8x1xf32> to vector<1x8x1xf32>
    %73 = vector.extract_strided_slice %0 {offsets = [32, 4], sizes = [8, 1], strides = [1, 1]} : vector<40x8xf32> to vector<8x1xf32>
    %74 = vector.shape_cast %73 : vector<8x1xf32> to vector<1x8x1xf32>
    %75 = vector.extract_strided_slice %0 {offsets = [32, 5], sizes = [8, 1], strides = [1, 1]} : vector<40x8xf32> to vector<8x1xf32>
    %76 = vector.shape_cast %75 : vector<8x1xf32> to vector<1x8x1xf32>
    %77 = vector.extract_strided_slice %0 {offsets = [32, 6], sizes = [8, 1], strides = [1, 1]} : vector<40x8xf32> to vector<8x1xf32>
    %78 = vector.shape_cast %77 : vector<8x1xf32> to vector<1x8x1xf32>
    %79 = vector.extract_strided_slice %0 {offsets = [32, 7], sizes = [8, 1], strides = [1, 1]} : vector<40x8xf32> to vector<8x1xf32>
    %80 = vector.shape_cast %79 : vector<8x1xf32> to vector<1x8x1xf32>
    %c0_1 = arith.constant 0 : index
    %c0_2 = arith.constant 0 : index
    %c0_3 = arith.constant 0 : index
    %81 = vector.load %arg1[%c0_1, %c0_2, %c0_3] : memref<1x4x16xf32, #tpu.memory_space<vmem>>, vector<1x4x9xf32>
    %82 = tpu.concatenate %81, %81 in 1 : vector<1x4x9xf32>, vector<1x4x9xf32> -> vector<1x8x9xf32>
    %83 = vector.broadcast %2 : vector<1x8x1xf32> to vector<1x8x9xf32>
    %84 = arith.subf %82, %83 : vector<1x8x9xf32>
    %85 = math.absf %84 : vector<1x8x9xf32>
    %86 = vector.broadcast %18 : vector<1x8x1xf32> to vector<1x8x9xf32>
    %87 = arith.subf %82, %86 : vector<1x8x9xf32>
    %88 = math.absf %87 : vector<1x8x9xf32>
    %89 = vector.broadcast %34 : vector<1x8x1xf32> to vector<1x8x9xf32>
    %90 = arith.subf %82, %89 : vector<1x8x9xf32>
    %91 = math.absf %90 : vector<1x8x9xf32>
    %92 = vector.broadcast %50 : vector<1x8x1xf32> to vector<1x8x9xf32>
    %93 = arith.subf %82, %92 : vector<1x8x9xf32>
    %94 = math.absf %93 : vector<1x8x9xf32>
    %95 = vector.broadcast %66 : vector<1x8x1xf32> to vector<1x8x9xf32>
    %96 = arith.subf %82, %95 : vector<1x8x9xf32>
    %97 = math.absf %96 : vector<1x8x9xf32>
    %c0_4 = arith.constant 0 : index
    %c0_5 = arith.constant 0 : index
    %c1 = arith.constant 1 : index
    %98 = vector.load %arg1[%c0_4, %c0_5, %c1] : memref<1x4x16xf32, #tpu.memory_space<vmem>>, vector<1x4x9xf32>
    %99 = tpu.concatenate %98, %98 in 1 : vector<1x4x9xf32>, vector<1x4x9xf32> -> vector<1x8x9xf32>
    %100 = vector.broadcast %4 : vector<1x8x1xf32> to vector<1x8x9xf32>
    %101 = arith.subf %99, %100 : vector<1x8x9xf32>
    %102 = math.absf %101 : vector<1x8x9xf32>
    %103 = arith.addf %85, %102 : vector<1x8x9xf32>
    %104 = vector.broadcast %20 : vector<1x8x1xf32> to vector<1x8x9xf32>
    %105 = arith.subf %99, %104 : vector<1x8x9xf32>
    %106 = math.absf %105 : vector<1x8x9xf32>
    %107 = arith.addf %88, %106 : vector<1x8x9xf32>
    %108 = vector.broadcast %36 : vector<1x8x1xf32> to vector<1x8x9xf32>
    %109 = arith.subf %99, %108 : vector<1x8x9xf32>
    %110 = math.absf %109 : vector<1x8x9xf32>
    %111 = arith.addf %91, %110 : vector<1x8x9xf32>
    %112 = vector.broadcast %52 : vector<1x8x1xf32> to vector<1x8x9xf32>
    %113 = arith.subf %99, %112 : vector<1x8x9xf32>
    %114 = math.absf %113 : vector<1x8x9xf32>
    %115 = arith.addf %94, %114 : vector<1x8x9xf32>
    %116 = vector.broadcast %68 : vector<1x8x1xf32> to vector<1x8x9xf32>
    %117 = arith.subf %99, %116 : vector<1x8x9xf32>
    %118 = math.absf %117 : vector<1x8x9xf32>
    %119 = arith.addf %97, %118 : vector<1x8x9xf32>
    %c0_6 = arith.constant 0 : index
    %c0_7 = arith.constant 0 : index
    %c2 = arith.constant 2 : index
    %120 = vector.load %arg1[%c0_6, %c0_7, %c2] : memref<1x4x16xf32, #tpu.memory_space<vmem>>, vector<1x4x9xf32>
    %121 = tpu.concatenate %120, %120 in 1 : vector<1x4x9xf32>, vector<1x4x9xf32> -> vector<1x8x9xf32>
    %122 = vector.broadcast %6 : vector<1x8x1xf32> to vector<1x8x9xf32>
    %123 = arith.subf %121, %122 : vector<1x8x9xf32>
    %124 = math.absf %123 : vector<1x8x9xf32>
    %125 = arith.addf %103, %124 : vector<1x8x9xf32>
    %126 = vector.broadcast %22 : vector<1x8x1xf32> to vector<1x8x9xf32>
    %127 = arith.subf %121, %126 : vector<1x8x9xf32>
    %128 = math.absf %127 : vector<1x8x9xf32>
    %129 = arith.addf %107, %128 : vector<1x8x9xf32>
    %130 = vector.broadcast %38 : vector<1x8x1xf32> to vector<1x8x9xf32>
    %131 = arith.subf %121, %130 : vector<1x8x9xf32>
    %132 = math.absf %131 : vector<1x8x9xf32>
    %133 = arith.addf %111, %132 : vector<1x8x9xf32>
    %134 = vector.broadcast %54 : vector<1x8x1xf32> to vector<1x8x9xf32>
    %135 = arith.subf %121, %134 : vector<1x8x9xf32>
    %136 = math.absf %135 : vector<1x8x9xf32>
    %137 = arith.addf %115, %136 : vector<1x8x9xf32>
    %138 = vector.broadcast %70 : vector<1x8x1xf32> to vector<1x8x9xf32>
    %139 = arith.subf %121, %138 : vector<1x8x9xf32>
    %140 = math.absf %139 : vector<1x8x9xf32>
    %141 = arith.addf %119, %140 : vector<1x8x9xf32>
    %c0_8 = arith.constant 0 : index
    %c0_9 = arith.constant 0 : index
    %c3 = arith.constant 3 : index
    %142 = vector.load %arg1[%c0_8, %c0_9, %c3] : memref<1x4x16xf32, #tpu.memory_space<vmem>>, vector<1x4x9xf32>
    %143 = tpu.concatenate %142, %142 in 1 : vector<1x4x9xf32>, vector<1x4x9xf32> -> vector<1x8x9xf32>
    %144 = vector.broadcast %8 : vector<1x8x1xf32> to vector<1x8x9xf32>
    %145 = arith.subf %143, %144 : vector<1x8x9xf32>
    %146 = math.absf %145 : vector<1x8x9xf32>
    %147 = arith.addf %125, %146 : vector<1x8x9xf32>
    %148 = vector.broadcast %24 : vector<1x8x1xf32> to vector<1x8x9xf32>
    %149 = arith.subf %143, %148 : vector<1x8x9xf32>
    %150 = math.absf %149 : vector<1x8x9xf32>
    %151 = arith.addf %129, %150 : vector<1x8x9xf32>
    %152 = vector.broadcast %40 : vector<1x8x1xf32> to vector<1x8x9xf32>
    %153 = arith.subf %143, %152 : vector<1x8x9xf32>
    %154 = math.absf %153 : vector<1x8x9xf32>
    %155 = arith.addf %133, %154 : vector<1x8x9xf32>
    %156 = vector.broadcast %56 : vector<1x8x1xf32> to vector<1x8x9xf32>
    %157 = arith.subf %143, %156 : vector<1x8x9xf32>
    %158 = math.absf %157 : vector<1x8x9xf32>
    %159 = arith.addf %137, %158 : vector<1x8x9xf32>
    %160 = vector.broadcast %72 : vector<1x8x1xf32> to vector<1x8x9xf32>
    %161 = arith.subf %143, %160 : vector<1x8x9xf32>
    %162 = math.absf %161 : vector<1x8x9xf32>
    %163 = arith.addf %141, %162 : vector<1x8x9xf32>
    %c0_10 = arith.constant 0 : index
    %c0_11 = arith.constant 0 : index
    %c4 = arith.constant 4 : index
    %164 = vector.load %arg1[%c0_10, %c0_11, %c4] : memref<1x4x16xf32, #tpu.memory_space<vmem>>, vector<1x4x9xf32>
    %165 = tpu.concatenate %164, %164 in 1 : vector<1x4x9xf32>, vector<1x4x9xf32> -> vector<1x8x9xf32>
    %166 = vector.broadcast %10 : vector<1x8x1xf32> to vector<1x8x9xf32>
    %167 = arith.subf %165, %166 : vector<1x8x9xf32>
    %168 = math.absf %167 : vector<1x8x9xf32>
    %169 = arith.addf %147, %168 : vector<1x8x9xf32>
    %170 = vector.broadcast %26 : vector<1x8x1xf32> to vector<1x8x9xf32>
    %171 = arith.subf %165, %170 : vector<1x8x9xf32>
    %172 = math.absf %171 : vector<1x8x9xf32>
    %173 = arith.addf %151, %172 : vector<1x8x9xf32>
    %174 = vector.broadcast %42 : vector<1x8x1xf32> to vector<1x8x9xf32>
    %175 = arith.subf %165, %174 : vector<1x8x9xf32>
    %176 = math.absf %175 : vector<1x8x9xf32>
    %177 = arith.addf %155, %176 : vector<1x8x9xf32>
    %178 = vector.broadcast %58 : vector<1x8x1xf32> to vector<1x8x9xf32>
    %179 = arith.subf %165, %178 : vector<1x8x9xf32>
    %180 = math.absf %179 : vector<1x8x9xf32>
    %181 = arith.addf %159, %180 : vector<1x8x9xf32>
    %182 = vector.broadcast %74 : vector<1x8x1xf32> to vector<1x8x9xf32>
    %183 = arith.subf %165, %182 : vector<1x8x9xf32>
    %184 = math.absf %183 : vector<1x8x9xf32>
    %185 = arith.addf %163, %184 : vector<1x8x9xf32>
    %c0_12 = arith.constant 0 : index
    %c0_13 = arith.constant 0 : index
    %c5 = arith.constant 5 : index
    %186 = vector.load %arg1[%c0_12, %c0_13, %c5] : memref<1x4x16xf32, #tpu.memory_space<vmem>>, vector<1x4x9xf32>
    %187 = tpu.concatenate %186, %186 in 1 : vector<1x4x9xf32>, vector<1x4x9xf32> -> vector<1x8x9xf32>
    %188 = vector.broadcast %12 : vector<1x8x1xf32> to vector<1x8x9xf32>
    %189 = arith.subf %187, %188 : vector<1x8x9xf32>
    %190 = math.absf %189 : vector<1x8x9xf32>
    %191 = arith.addf %169, %190 : vector<1x8x9xf32>
    %192 = vector.broadcast %28 : vector<1x8x1xf32> to vector<1x8x9xf32>
    %193 = arith.subf %187, %192 : vector<1x8x9xf32>
    %194 = math.absf %193 : vector<1x8x9xf32>
    %195 = arith.addf %173, %194 : vector<1x8x9xf32>
    %196 = vector.broadcast %44 : vector<1x8x1xf32> to vector<1x8x9xf32>
    %197 = arith.subf %187, %196 : vector<1x8x9xf32>
    %198 = math.absf %197 : vector<1x8x9xf32>
    %199 = arith.addf %177, %198 : vector<1x8x9xf32>
    %200 = vector.broadcast %60 : vector<1x8x1xf32> to vector<1x8x9xf32>
    %201 = arith.subf %187, %200 : vector<1x8x9xf32>
    %202 = math.absf %201 : vector<1x8x9xf32>
    %203 = arith.addf %181, %202 : vector<1x8x9xf32>
    %204 = vector.broadcast %76 : vector<1x8x1xf32> to vector<1x8x9xf32>
    %205 = arith.subf %187, %204 : vector<1x8x9xf32>
    %206 = math.absf %205 : vector<1x8x9xf32>
    %207 = arith.addf %185, %206 : vector<1x8x9xf32>
    %c0_14 = arith.constant 0 : index
    %c0_15 = arith.constant 0 : index
    %c6 = arith.constant 6 : index
    %208 = vector.load %arg1[%c0_14, %c0_15, %c6] : memref<1x4x16xf32, #tpu.memory_space<vmem>>, vector<1x4x9xf32>
    %209 = tpu.concatenate %208, %208 in 1 : vector<1x4x9xf32>, vector<1x4x9xf32> -> vector<1x8x9xf32>
    %210 = vector.broadcast %14 : vector<1x8x1xf32> to vector<1x8x9xf32>
    %211 = arith.subf %209, %210 : vector<1x8x9xf32>
    %212 = math.absf %211 : vector<1x8x9xf32>
    %213 = arith.addf %191, %212 : vector<1x8x9xf32>
    %214 = vector.broadcast %30 : vector<1x8x1xf32> to vector<1x8x9xf32>
    %215 = arith.subf %209, %214 : vector<1x8x9xf32>
    %216 = math.absf %215 : vector<1x8x9xf32>
    %217 = arith.addf %195, %216 : vector<1x8x9xf32>
    %218 = vector.broadcast %46 : vector<1x8x1xf32> to vector<1x8x9xf32>
    %219 = arith.subf %209, %218 : vector<1x8x9xf32>
    %220 = math.absf %219 : vector<1x8x9xf32>
    %221 = arith.addf %199, %220 : vector<1x8x9xf32>
    %222 = vector.broadcast %62 : vector<1x8x1xf32> to vector<1x8x9xf32>
    %223 = arith.subf %209, %222 : vector<1x8x9xf32>
    %224 = math.absf %223 : vector<1x8x9xf32>
    %225 = arith.addf %203, %224 : vector<1x8x9xf32>
    %226 = vector.broadcast %78 : vector<1x8x1xf32> to vector<1x8x9xf32>
    %227 = arith.subf %209, %226 : vector<1x8x9xf32>
    %228 = math.absf %227 : vector<1x8x9xf32>
    %229 = arith.addf %207, %228 : vector<1x8x9xf32>
    %c0_16 = arith.constant 0 : index
    %c0_17 = arith.constant 0 : index
    %c7 = arith.constant 7 : index
    %230 = vector.load %arg1[%c0_16, %c0_17, %c7] : memref<1x4x16xf32, #tpu.memory_space<vmem>>, vector<1x4x9xf32>
    %231 = tpu.concatenate %230, %230 in 1 : vector<1x4x9xf32>, vector<1x4x9xf32> -> vector<1x8x9xf32>
    %232 = vector.broadcast %16 : vector<1x8x1xf32> to vector<1x8x9xf32>
    %233 = arith.subf %231, %232 : vector<1x8x9xf32>
    %234 = math.absf %233 : vector<1x8x9xf32>
    %235 = arith.addf %213, %234 : vector<1x8x9xf32>
    %236 = vector.broadcast %32 : vector<1x8x1xf32> to vector<1x8x9xf32>
    %237 = arith.subf %231, %236 : vector<1x8x9xf32>
    %238 = math.absf %237 : vector<1x8x9xf32>
    %239 = arith.addf %217, %238 : vector<1x8x9xf32>
    %240 = vector.broadcast %48 : vector<1x8x1xf32> to vector<1x8x9xf32>
    %241 = arith.subf %231, %240 : vector<1x8x9xf32>
    %242 = math.absf %241 : vector<1x8x9xf32>
    %243 = arith.addf %221, %242 : vector<1x8x9xf32>
    %244 = vector.broadcast %64 : vector<1x8x1xf32> to vector<1x8x9xf32>
    %245 = arith.subf %231, %244 : vector<1x8x9xf32>
    %246 = math.absf %245 : vector<1x8x9xf32>
    %247 = arith.addf %225, %246 : vector<1x8x9xf32>
    %248 = vector.broadcast %80 : vector<1x8x1xf32> to vector<1x8x9xf32>
    %249 = arith.subf %231, %248 : vector<1x8x9xf32>
    %250 = math.absf %249 : vector<1x8x9xf32>
    %251 = arith.addf %229, %250 : vector<1x8x9xf32>
    %cst = arith.constant dense<0x7F800000> : vector<1x8xf32>
    %252 = vector.multi_reduction <minimumf>, %235, %cst [2] : vector<1x8x9xf32> to vector<1x8xf32>
    %cst_18 = arith.constant dense<0x7F800000> : vector<1x8xf32>
    %253 = vector.multi_reduction <minimumf>, %239, %cst_18 [2] : vector<1x8x9xf32> to vector<1x8xf32>
    %cst_19 = arith.constant dense<0x7F800000> : vector<1x8xf32>
    %254 = vector.multi_reduction <minimumf>, %243, %cst_19 [2] : vector<1x8x9xf32> to vector<1x8xf32>
    %cst_20 = arith.constant dense<0x7F800000> : vector<1x8xf32>
    %255 = vector.multi_reduction <minimumf>, %247, %cst_20 [2] : vector<1x8x9xf32> to vector<1x8xf32>
    %cst_21 = arith.constant dense<0x7F800000> : vector<1x8xf32>
    %256 = vector.multi_reduction <minimumf>, %251, %cst_21 [2] : vector<1x8x9xf32> to vector<1x8xf32>
    %257 = tpu.concatenate %252, %253, %254, %255, %256 in 1 : vector<1x8xf32>, vector<1x8xf32>, vector<1x8xf32>, vector<1x8xf32>, vector<1x8xf32> -> vector<1x40xf32>
    %cst_22 = arith.constant 1.250000e-01 : f32
    %258 = vector.broadcast %cst_22 : f32 to vector<1x40xf32>
    %259 = arith.mulf %257, %258 : vector<1x40xf32>
    %260 = arith.mulf %259, %259 : vector<1x40xf32>
    %cst_23 = arith.constant 0.000000e+00 : f32
    %261 = vector.broadcast %cst_23 : f32 to vector<1x40xf32>
    %262 = arith.subf %261, %260 : vector<1x40xf32>
    %263 = math.exp %262 : vector<1x40xf32>
    %264 = vector.shape_cast %263 : vector<1x40xf32> to vector<1x1x40xf32>
    %c0_24 = arith.constant 0 : index
    %c0_25 = arith.constant 0 : index
    %c0_26 = arith.constant 0 : index
    %265 = vector.load %arg3[%c0_24, %c0_25, %c0_26] : memref<1x1x40xf32, #tpu.memory_space<vmem>>, vector<1x1x40xf32>
    tpu.vector_store %arg3[%c0_24, %c0_25, %c0_26], %264 {strides = array<i32>} : memref<1x1x40xf32, #tpu.memory_space<vmem>>, vector<1x1x40xf32>,
    %266 = vector.shape_cast %259 : vector<1x40xf32> to vector<1x1x40xf32>
    %c0_27 = arith.constant 0 : index
    %c0_28 = arith.constant 0 : index
    %c0_29 = arith.constant 0 : index
    %267 = vector.load %arg4[%c0_27, %c0_28, %c0_29] : memref<1x1x40xf32, #tpu.memory_space<vmem>>, vector<1x1x40xf32>
    tpu.vector_store %arg4[%c0_27, %c0_28, %c0_29], %266 {strides = array<i32>} : memref<1x1x40xf32, #tpu.memory_space<vmem>>, vector<1x1x40xf32>,
    return
  }
  func.func @transform_0(%arg0: i32) -> (i32, i32, i32) {
    %c0_i32 = arith.constant 0 : i32
    %c0_i32_0 = arith.constant 0 : i32
    %c0_i32_1 = arith.constant 0 : i32
    return %arg0, %c0_i32, %c0_i32_0 : i32, i32, i32
  }
  func.func @transform_1(%arg0: i32) -> (i32, i32) {
    %c0_i32 = arith.constant 0 : i32
    %c0_i32_0 = arith.constant 0 : i32
    %c0_i32_1 = arith.constant 0 : i32
    return %c0_i32, %c0_i32_0 : i32, i32
  }
  func.func @transform_2(%arg0: i32) -> (i32, i32, i32) {
    %c0_i32 = arith.constant 0 : i32
    %c0_i32_0 = arith.constant 0 : i32
    %c0_i32_1 = arith.constant 0 : i32
    return %arg0, %c0_i32, %c0_i32_0 : i32, i32, i32
  }
  func.func @transform_3(%arg0: i32) -> (i32, i32, i32) {
    %c0_i32 = arith.constant 0 : i32
    %c0_i32_0 = arith.constant 0 : i32
    %c0_i32_1 = arith.constant 0 : i32
    return %arg0, %c0_i32, %c0_i32_0 : i32, i32, i32
  }
}

</mosaic_0001>

<bundles_post_ra>
// kernel: tpu_custom_call.1
= control target key start
LH: loop header
LB: loop body
LE: loop exit
PB: predicated region body
PF: predicated region fallthrough
CT: control target
= control target key end

     0   :  { %9 = vsyncpa [#allocation3], 0  ;;  %s1272_s0 = inlined_call_operand.vmem [shape: f32[2,4,16], index: 0, kind: input, shape index: {}]   ;;  %s1273_s1 = inlined_call_operand.vmem [shape: f32[40,8], index: 1, kind: input, shape index: {}]   ;;  %s1274_s2 = inlined_call_operand.hbm [shape: f32[2,1,40], index: 2, kind: output, shape index: {0}]   ;;  %s1275_s3 = inlined_call_operand.hbm [shape: f32[2,1,40], index: 3, kind: output, shape index: {1}]  }
   0x1   :  { %11 = vsyncpa [#allocation3 + $0x1], 0 }
   0x2   :  { %12 = vsyncpa [#allocation5], 0 }
   0x3   :  { %14 = vsyncpa [#allocation5 + $0x1], 0  ;;  %s1019_s12 = smov 0   ;;  %s1021_s13 = smov 0  }
   0x4   :  { %s1023_s14 = smov 0   ;;  %s1025_s15 = smov 0  }
   0x5 LB: > { %s1040_s16 = sadd.s32 4294967295, %s980_s15   ;;  %s787_s17 = sadd.s32 4294967294, %s980_s15   ;;  %s980_s15 = sphi %s1025_s15, %s1281_s15   ;;  %s976_s14 = sphi %s1023_s14, %s1280_s14   ;;  %s972_s13 = sphi %s1021_s13, %s1279_s13   ;;  %s968_s12 = sphi %s1019_s12, %s1278_s12  }
   0x6   : > { %s1044_s18 = sadd.s32 1, %s980_s15   ;;  %s74_s19 = sadd.s32 1, %s976_s14 }
   0x7   : > { %s71_s20 = ssub.s32 %s980_s15, %s1044_s18  ;;  %p84_p0 = scmp.ne.s32.totalorder %s976_s14, %s972_s13 }
   0x8   : > { %p72_p1 = scmp.eq.s32.totalorder %s71_s20, 0  ;;  %p85_p2 = scmp.eq.s32.totalorder %s1040_s16, 1 }
   0x9   : > { %p90_p3 = scmp.ne.s32.totalorder %s972_s13, %s968_s12  ;;  %p91_p4 = scmp.eq.s32.totalorder %s787_s17, 1 }
   0xa   : > { %s1055_s21 = scalar_select %p72_p1, %s976_s14, %s74_s19  }
   0xb   : > { %p1057_p5 = por %p85_p2, %p84_p0  ;;  %p1061_p6 = por %p91_p4, %p90_p3 }
   0xc   : > { %p790_p7 = scmp.ge.s32.totalorder %s980_s15, 1  ;;  %p145_p8 = scmp.lt.s32.totalorder %s980_s15, 3 }
   0xe   : > { %p146_p9 = pnand %p790_p7, %p145_p8 }
   0xf   : > { %v1070_v0 = vld [vmem:[%s1273_s1 + $0x10] sm:$0xff] (!%p146_p9)  ;;  %v1075_v1 = vld [vmem:[%s1273_s1] sm:$0xff] (!%p146_p9)  ;;  %v982_v2 = vmov (!%p146_p9), 0   ;;  %v983_v3 = vmov (!%p146_p9), 1   ;;  %v178_v4 = vld [vmem:[%s1273_s1 + $0x18] sm:$0xff] (!%p146_p9)  ;;  %v984_v6 = vmov (!%p146_p9), 2  }
  0x10   : > { %149 = sbr.rel (%p146_p9) target bundleno = 563 (0x233), region = 28  ;;  %855 = vset.pattern.permute.xlu1 (!%p146_p9), %v982_v2  ;;  %856 = vset.pattern.permute.xlu0 (!%p146_p9), %v983_v3  ;;  %v176_v5 = vld [vmem:[%s1273_s1 + $0x8] sm:$0xff] (!%p146_p9)  ;;  %v985_v7 = vmov (!%p146_p9), 3   ;;  %v179_v8 = vld [vmem:[%s1273_s1 + $0x20] sm:$0xff] (!%p146_p9)  ;;  %v986_v9 = vmov (!%p146_p9), 4   ;;  %v987_v10 = vmov (!%p146_p9), 5  }
  0x11   : > { %202 = vperm.xlu1 (!%p146_p9), %855, %v1070_v0   ;;  %222 = vperm.xlu0 (!%p146_p9), %856, %v1075_v1   ;;  %v988_v11 = vmov (!%p146_p9), 6   ;;  %v989_v12 = vmov (!%p146_p9), 7   ;;  %p171_p10 = scmp.lt.s32.totalorder (!%p146_p9), %s1040_s16, 1  ;;  %vm184_vm0 = vcmask (!%p146_p9), 1043456   ;;  %s990_s17 = smov (!%p146_p9), 127   ;;  %vm606_vm1 = vcmask (!%p146_p9), 72704  }
  0x12   : > { %s991_s19 = smov (!%p146_p9), 126   ;;  %s992_s20 = smov (!%p146_p9), 125   ;;  %vm658_vm2 = vcmask (!%p146_p9), 64512   ;;  %vm660_vm3 = vcmask (!%p146_p9), 130048   ;;  %vm662_vm4 = vcmask (!%p146_p9), 195584   ;;  %vm664_vm5 = vcmask (!%p146_p9), 261120  }
  0x13   : > { %s993_s24 = smov (!%p146_p9), 124   ;;  %s994_s25 = smov (!%p146_p9), 123   ;;  %vm671_vm6 = vcmask (!%p146_p9), 319488  }
  0x14   : > { %s995_s26 = smov (!%p146_p9), 122   ;;  %s996_s27 = smov (!%p146_p9), 121  }
  0x15   : > { %209 = vperm.xlu1 (!%p146_p9), %855, %v178_v4   ;;  %255 = vperm.xlu0 (!%p146_p9), %856, %v178_v4   ;;  %s1186_s28 = sand.u32 (!%p146_p9), 1, %s972_s13   ;;  %s792_s29 = sshll.u32 (!%p146_p9), %s1040_s16, 4 }
  0x16   : > { %s170_s30 = scalar_lea.vmem (!%p146_p9), [#allocation4], %s1186_s28  ;;  %s997_s10 = smov (!%p146_p9), [#allocation4]  }
  0x17   : > { %s172_s7 = scalar_select %p171_p10, %s1040_s16, 1 }
  0x18   : > { %s704_s4 = sshll.u32 %s170_s30, 4  ;;  %s1197_s4 = int_to_ptr.vmem [resolvable:$true] %s704_s4 }
  0x19   : > { %857 = vset.pattern.permute.xlu1 %v983_v3  ;;  %859 = vset.pattern.permute.xlu0 %v984_v6  ;;  %s791_s8 = sshll.u32 %s172_s7, 2  ;;  %s1195_s7 = scalar_lea.hbm %s1275_s3, %s792_s29 }
  0x1a   : > { %233 = vperm.xlu1 %857, %v176_v5   ;;  %288 = vperm.xlu0 %859, %v176_v5   ;;  %s174_s11 = scalar_lea.vmem %s1272_s0, %s791_s8  ;;  %s679_s8 = scalar_lea.sflag [#allocation5], %s1186_s28 }
  0x1b   : > { %v180_v13 = vld [vmem:[%s174_s11] sm:$0xf]  ;;  %s886_s9 = scalar_lea.vmem %s1197_s4, 16  ;;  %s890_s11 = sshll.u32 %s997_s10, 4  ;;  %s891_s11 = int_to_ptr.vmem [resolvable:$false] %s890_s11 }
  0x1c   : > { %v182_v14 = vrot.slane %v180_v13, 4  ;;  %p887_p11 = scmp.ne.s32.totalorder %s1197_s4, %s886_s9  ;;  %p893_p0 = scmp.lt.s32.totalorder %s1197_s4, %s891_s11 }
  0x1e   : > { %244 = vperm.xlu1 %857, %v1070_v0   ;;  %310 = vperm.xlu0 %859, %v178_v4   ;;  %v1109_v16 = vsel %vm184_vm0, %v180_v13, %v182_v14  ;;  %p888_p12 = pnand %p887_p11, %p1057_p5 }
  0x20   : > { %p889_p13 = pneg %p888_p12 }
  0x22   : > { %858 = vset.pattern.permute.xlu1 %v984_v6  ;;  %863 = vset.pattern.permute.xlu0 %v985_v7 }
  0x23   : > { %277 = vperm.xlu1 %858, %v1075_v1   ;;  %343 = vperm.xlu0 %863, %v176_v5  }
  0x27   : > { %860 = vset.pattern.permute.xlu1 %v983_v3  ;;  %365 = vperm.xlu0 %863, %v178_v4  }
  0x28   : > { %266 = vperm.xlu1 %860, %v179_v8  }
  0x2b   : > { %867 = vset.pattern.permute.xlu0 %v986_v9 }
  0x2c   : > { %861 = vset.pattern.permute.xlu1 %v984_v6  ;;  %398 = vperm.xlu0 %867, %v176_v5  }
  0x2d   : > { %299 = vperm.xlu1 %861, %v1070_v0  }
  0x30   : > { %420 = vperm.xlu0 %867, %v178_v4  }
  0x31   : > { %862 = vset.pattern.permute.xlu1 %v985_v7 }
  0x32   : > { %332 = vperm.xlu1 %862, %v1075_v1  }
  0x34   : > { %871 = vset.pattern.permute.xlu0 %v987_v10 }
  0x35   : > { %453 = vperm.xlu0 %871, %v176_v5  }
  0x36   : > { %864 = vset.pattern.permute.xlu1 %v984_v6 }
  0x37   : > { %321 = vperm.xlu1 %864, %v179_v8  }
  0x39   : > { %475 = vperm.xlu0 %871, %v178_v4  }
  0x3b   : > { %865 = vset.pattern.permute.xlu1 %v985_v7 }
  0x3c   : > { %354 = vperm.xlu1 %865, %v1070_v0  }
  0x3d   : > { %875 = vset.pattern.permute.xlu0 %v988_v11 }
  0x3e   : > { %508 = vperm.xlu0 %875, %v176_v5  }
  0x40   : > { %866 = vset.pattern.permute.xlu1 %v986_v9 }
  0x41   : > { %387 = vperm.xlu1 %866, %v1075_v1  }
  0x42   : > { %530 = vperm.xlu0 %875, %v178_v4  }
  0x45   : > { %868 = vset.pattern.permute.xlu1 %v985_v7 }
  0x46   : > { %376 = vperm.xlu1 %868, %v179_v8   ;;  %879 = vset.pattern.permute.xlu0 %v989_v12 }
  0x47   : > { %563 = vperm.xlu0 %879, %v176_v5  }
  0x4a   : > { %869 = vset.pattern.permute.xlu1 %v986_v9 }
  0x4b   : > { %409 = vperm.xlu1 %869, %v1070_v0   ;;  %585 = vperm.xlu0 %879, %v178_v4  }
  0x4f   : > { %870 = vset.pattern.permute.xlu1 %v987_v10  ;;  %882 = vset.pattern.permute.xlu0 %v982_v2 }
  0x50   : > { %442 = vperm.xlu1 %870, %v1075_v1   ;;  %188 = vperm.xlu0 %882, %v1075_v1  }
  0x54   : > { %872 = vset.pattern.permute.xlu1 %v986_v9  ;;  %195 = vperm.xlu0 %882, %v176_v5  }
  0x55   : > { %431 = vperm.xlu1 %872, %v179_v8  }
  0x58   : > { %216 = vperm.xlu0 %882, %v179_v8  }
  0x59   : > { %873 = vset.pattern.permute.xlu1 %v987_v10 }
  0x5a   : > { %464 = vperm.xlu1 %873, %v1070_v0  }
  0x5c   : > { %883 = vset.pattern.permute.xlu0 %v989_v12 }
  0x5e   : > { %874 = vset.pattern.permute.xlu1 %v988_v11 }
  0x5f   : > { %497 = vperm.xlu1 %874, %v1075_v1  }
  0x63   : > { %876 = vset.pattern.permute.xlu1 %v987_v10 }
  0x64   : > { %486 = vperm.xlu1 %876, %v179_v8  }
  0x68   : > { %877 = vset.pattern.permute.xlu1 %v988_v11 }
  0x69   : > { %519 = vperm.xlu1 %877, %v1070_v0  }
  0x6d   : > { %878 = vset.pattern.permute.xlu1 %v989_v12 }
  0x6e   : > { %552 = vperm.xlu1 %878, %v1075_v1  }
  0x72   : > { %880 = vset.pattern.permute.xlu1 %v988_v11 }
  0x73   : > { %541 = vperm.xlu1 %880, %v179_v8  }
  0x77   : > { %881 = vset.pattern.permute.xlu1 %v989_v12 }
  0x78   : > { %574 = vperm.xlu1 %881, %v1070_v0  }
  0x7c   : > { %596 = vperm.xlu1 %881, %v179_v8  }
  0x90   : > { %v1107_v15 = vpop.permute.xlu1 %202  ;;  %v223_v17 = vpop.permute.xlu0 %222 }
  0x91   : > { %v225_v18 = vsub.f32 %v1109_v16, %v223_v17 }
  0x93   : > { %v226_v19 = vand.u32 2147483647, %v225_v18 }
  0x94   : > { %v1112_v20 = vpop.permute.xlu1 %209  ;;  %v256_v21 = vpop.permute.xlu0 %255 }
  0x95   : > { %228 = vrot.lane.b32.xlu1 %v226_v19, %s990_s17  ;;  %v258_v24 = vsub.f32 %v1109_v16, %v256_v21 }
  0x97   : > { %v259_v29 = vand.u32 2147483647, %v258_v24 }
  0x99   : > { %v234_v22 = vpop.permute.xlu1 %233  ;;  %v289_v25 = vpop.permute.xlu0 %288 }
  0x9a   : > { %v236_v23 = vsub.f32 %v1109_v16, %v234_v22  ;;  %v291_v30 = vsub.f32 %v1109_v16, %v289_v25 }
  0x9c   : > { %v237_v26 = vand.u32 2147483647, %v236_v23  ;;  %v292_v32 = vand.u32 2147483647, %v291_v30 }
  0x9d   : > { %v245_v27 = vpop.permute.xlu1 %244  ;;  %v311_v35 = vpop.permute.xlu0 %310 }
  0x9e   : > { %v247_v28 = vsub.f32 %v1109_v16, %v245_v27  ;;  %239 = vrot.lane.b32.xlu1 %v237_v26, %s990_s17  ;;  %v313_v39 = vsub.f32 %v1109_v16, %v311_v35 }
  0xa0   : > { %v248_v31 = vand.u32 2147483647, %v247_v28  ;;  %v314_v42 = vand.u32 2147483647, %v313_v39 }
  0xa2   : > { %v278_v33 = vpop.permute.xlu1 %277  ;;  %250 = vrot.lane.b32.xlu0 %v248_v31, %s990_s17  ;;  %261 = vrot.lane.b32.xlu1 %v259_v29, %s990_s17  ;;  %v344_v40 = vpop.permute.xlu0 %343 }
  0xa3   : > { %v280_v34 = vsub.f32 %v1109_v16, %v278_v33  ;;  %v346_v44 = vsub.f32 %v1109_v16, %v344_v40 }
  0xa5   : > { %v281_v36 = vand.u32 2147483647, %v280_v34  ;;  %v347_v47 = vand.u32 2147483647, %v346_v44 }
  0xa6   : > { %294 = vrot.lane.b32.xlu1 %v292_v32, %s991_s19  ;;  %v366_v50 = vpop.permute.xlu0 %365 }
  0xa7   : > { %v267_v37 = vpop.permute.xlu1 %266  ;;  %283 = vrot.lane.b32.xlu0 %v281_v36, %s991_s19  ;;  %v368_v54 = vsub.f32 %v1109_v16, %v366_v50 }
  0xa8   : > { %v269_v38 = vsub.f32 %v1109_v16, %v267_v37 }
  0xa9   : > { %v369_v57 = vand.u32 2147483647, %v368_v54 }
  0xaa   : > { %v270_v41 = vand.u32 2147483647, %v269_v38 }
  0xab   : > { %v399_v55 = vpop.permute.xlu0 %398 }
  0xac   : > { %v300_v43 = vpop.permute.xlu1 %299  ;;  %272 = vrot.lane.b32.xlu0 %v270_v41, %s990_s17  ;;  %v401_v59 = vsub.f32 %v1109_v16, %v399_v55  ;;  %s892_s17 = scalar_lea.vmem %s891_s11, 32 }
  0xad   : > { %v302_v45 = vsub.f32 %v1109_v16, %v300_v43  ;;  %p894_p1 = scmp.lt.s32.totalorder %s892_s17, %s886_s9 }
  0xae   : > { %v402_v62 = vand.u32 2147483647, %v401_v59 }
  0xaf   : > { %v303_v46 = vand.u32 2147483647, %v302_v45  ;;  %v421_v1 = vpop.permute.xlu0 %420  ;;  %p895_p2 = por %p894_p1, %p893_p0 }
  0xb0   : > { %316 = vrot.lane.b32.xlu0 %v314_v42, %s991_s19  ;;  %v423_v5 = vsub.f32 %v1109_v16, %v421_v1 }
  0xb1   : > { %v333_v48 = vpop.permute.xlu1 %332  ;;  %305 = vrot.lane.b32.xlu1 %v303_v46, %s991_s19  ;;  %p896_p3 = pnand %p895_p2, %p889_p13 }
  0xb2   : > { %v335_v49 = vsub.f32 %v1109_v16, %v333_v48  ;;  %v424_v8 = vand.u32 2147483647, %v423_v5 }
  0xb4   : > { %v336_v51 = vand.u32 2147483647, %v335_v49  ;;  %349 = vrot.lane.b32.xlu0 %v347_v47, %s992_s20  ;;  %v454_v6 = vpop.permute.xlu0 %453 }
  0xb5   : > { %v456_v10 = vsub.f32 %v1109_v16, %v454_v6 }
  0xb6   : > { %v322_v52 = vpop.permute.xlu1 %321  ;;  %338 = vrot.lane.b32.xlu1 %v336_v51, %s992_s20 }
  0xb7   : > { %v324_v53 = vsub.f32 %v1109_v16, %v322_v52  ;;  %v457_v13 = vand.u32 2147483647, %v456_v10 }
  0xb8   : > { %v476_v18 = vpop.permute.xlu0 %475 }
  0xb9   : > { %v325_v56 = vand.u32 2147483647, %v324_v53  ;;  %v478_v23 = vsub.f32 %v1109_v16, %v476_v18 }
  0xbb   : > { %v355_v58 = vpop.permute.xlu1 %354  ;;  %327 = vrot.lane.b32.xlu1 %v325_v56, %s991_s19  ;;  %v479_v26 = vand.u32 2147483647, %v478_v23 }
  0xbc   : > { %v357_v60 = vsub.f32 %v1109_v16, %v355_v58 }
  0xbd   : > { %v509_v24 = vpop.permute.xlu0 %508 }
  0xbe   : > { %v358_v61 = vand.u32 2147483647, %v357_v60  ;;  %v511_v28 = vsub.f32 %v1109_v16, %v509_v24 }
  0xbf   : > { %371 = vrot.lane.b32.xlu1 %v369_v57, %s992_s20 }
  0xc0   : > { %v388_v63 = vpop.permute.xlu1 %387  ;;  %360 = vrot.lane.b32.xlu0 %v358_v61, %s992_s20  ;;  %v512_v31 = vand.u32 2147483647, %v511_v28 }
  0xc1   : > { %v390_v0 = vsub.f32 %v1109_v16, %v388_v63  ;;  %v531_v34 = vpop.permute.xlu0 %530 }
  0xc2   : > { %v533_v38 = vsub.f32 %v1109_v16, %v531_v34 }
  0xc3   : > { %v391_v2 = vand.u32 2147483647, %v390_v0  ;;  %404 = vrot.lane.b32.xlu1 %v402_v62, %s993_s24 }
  0xc4   : > { %v534_v41 = vand.u32 2147483647, %v533_v38 }
  0xc5   : > { %v377_v3 = vpop.permute.xlu1 %376  ;;  %393 = vrot.lane.b32.xlu0 %v391_v2, %s993_s24 }
  0xc6   : > { %v379_v4 = vsub.f32 %v1109_v16, %v377_v3  ;;  %v564_v39 = vpop.permute.xlu0 %563 }
  0xc7   : > { %v566_v43 = vsub.f32 %v1109_v16, %v564_v39 }
  0xc8   : > { %v380_v7 = vand.u32 2147483647, %v379_v4 }
  0xc9   : > { %v567_v46 = vand.u32 2147483647, %v566_v43 }
  0xca   : > { %v410_v9 = vpop.permute.xlu1 %409  ;;  %382 = vrot.lane.b32.xlu0 %v380_v7, %s992_s20  ;;  %v586_v51 = vpop.permute.xlu0 %585 }
  0xcb   : > { %v412_v11 = vsub.f32 %v1109_v16, %v410_v9  ;;  %v588_v54 = vsub.f32 %v1109_v16, %v586_v51 }
  0xcd   : > { %v413_v12 = vand.u32 2147483647, %v412_v11  ;;  %v589_v57 = vand.u32 2147483647, %v588_v54 }
  0xce   : > { %426 = vrot.lane.b32.xlu0 %v424_v8, %s993_s24 }
  0xcf   : > { %v443_v14 = vpop.permute.xlu1 %442  ;;  %415 = vrot.lane.b32.xlu1 %v413_v12, %s993_s24  ;;  %v189_v62 = vpop.permute.xlu0 %188 }
  0xd0   : > { %v445_v17 = vsub.f32 %v1109_v16, %v443_v14 }
  0xd2   : > { %v446_v19 = vand.u32 2147483647, %v445_v17  ;;  %459 = vrot.lane.b32.xlu0 %v457_v13, %s994_s25 }
  0xd3   : > { %v196_v63 = vpop.permute.xlu0 %195 }
  0xd4   : > { %v432_v21 = vpop.permute.xlu1 %431  ;;  %448 = vrot.lane.b32.xlu1 %v446_v19, %s994_s25 }
  0xd5   : > { %v434_v22 = vsub.f32 %v1109_v16, %v432_v21 }
  0xd7   : > { %v435_v25 = vand.u32 2147483647, %v434_v22  ;;  %v217_v1 = vpop.permute.xlu0 %216 }
  0xd9   : > { %v465_v27 = vpop.permute.xlu1 %464  ;;  %437 = vrot.lane.b32.xlu1 %v435_v25, %s993_s24  ;;  %v191_v25 = vsub.f32 %v1109_v16, %v189_v62 }
  0xda   : > { %v467_v29 = vsub.f32 %v1109_v16, %v465_v27 }
  0xdc   : > { %v468_v30 = vand.u32 2147483647, %v467_v29  ;;  %v192_v29 = vand.u32 2147483647, %v191_v25  ;;  %v623_v25 = vlaneseq }
  0xdd   : > { %481 = vrot.lane.b32.xlu1 %v479_v26, %s994_s25  ;;  %v198_v26 = vsub.f32 %v1109_v16, %v196_v63 }
  0xde   : > { %v498_v32 = vpop.permute.xlu1 %497  ;;  %470 = vrot.lane.b32.xlu0 %v468_v30, %s994_s25 }
  0xdf   : > { %v500_v33 = vsub.f32 %v1109_v16, %v498_v32  ;;  %v199_v30 = vand.u32 2147483647, %v198_v26  ;;  %v624_v26 = vand.u32 127, %v623_v25 }
  0xe1   : > { %v501_v35 = vand.u32 2147483647, %v500_v33  ;;  %514 = vrot.lane.b32.xlu1 %v512_v31, %s995_s26 }
  0xe3   : > { %v487_v36 = vpop.permute.xlu1 %486  ;;  %503 = vrot.lane.b32.xlu0 %v501_v35, %s995_s26 }
  0xe4   : > { %v489_v37 = vsub.f32 %v1109_v16, %v487_v36 }
  0xe6   : > { %v490_v40 = vand.u32 2147483647, %v489_v37 }
  0xe8   : > { %v520_v42 = vpop.permute.xlu1 %519  ;;  %492 = vrot.lane.b32.xlu0 %v490_v40, %s994_s25  ;;  %v212_v40 = vsub.f32 %v1109_v16, %v1112_v20 }
  0xe9   : > { %v522_v44 = vsub.f32 %v1109_v16, %v520_v42 }
  0xeb   : > { %v523_v45 = vand.u32 2147483647, %v522_v44 }
  0xec   : > { %536 = vrot.lane.b32.xlu0 %v534_v41, %s995_s26  ;;  %v205_v41 = vsub.f32 %v1109_v16, %v1107_v15 }
  0xed   : > { %v553_v47 = vpop.permute.xlu1 %552  ;;  %525 = vrot.lane.b32.xlu1 %v523_v45, %s995_s26  ;;  %v219_v45 = vsub.f32 %v1109_v16, %v217_v1 }
  0xee   : > { %v555_v48 = vsub.f32 %v1109_v16, %v553_v47 }
  0xf0   : > { %v556_v49 = vand.u32 2147483647, %v555_v48  ;;  %569 = vrot.lane.b32.xlu0 %v567_v46, %s996_s27 }
  0xf2   : > { %v542_v50 = vpop.permute.xlu1 %541  ;;  %558 = vrot.lane.b32.xlu1 %v556_v49, %s996_s27  ;;  %v213_v49 = vand.u32 2147483647, %v212_v40 }
  0xf3   : > { %v544_v52 = vsub.f32 %v1109_v16, %v542_v50  ;;  %v206_v50 = vand.u32 2147483647, %v205_v41 }
  0xf5   : > { %v545_v53 = vand.u32 2147483647, %v544_v52 }
  0xf7   : > { %v575_v55 = vpop.permute.xlu1 %574  ;;  %547 = vrot.lane.b32.xlu1 %v545_v53, %s995_s26 }
  0xf8   : > { %v577_v56 = vsub.f32 %v1109_v16, %v575_v55  ;;  %v220_v55 = vand.u32 2147483647, %v219_v45 }
  0xfa   : > { %v578_v58 = vand.u32 2147483647, %v577_v56 }
  0xfb   : > { %v597_v59 = vpop.permute.xlu1 %596  ;;  %591 = vrot.lane.b32.xlu1 %v589_v57, %s996_s27 }
  0xfc   : > { %v599_v60 = vsub.f32 %v1109_v16, %v597_v59  ;;  %580 = vrot.lane.b32.xlu0 %v578_v58, %s996_s27 }
  0xfe   : > { %v600_v61 = vand.u32 2147483647, %v599_v60 }
 0x100   : > { %602 = vrot.lane.b32.xlu0 %v600_v61, %s996_s27 }
 0x107   : > { %v229_v0 = vpop.permute.xlu1 %228 }
 0x108   : > { %v231_v33 = vadd.f32 %v229_v0, %v192_v29  ;;  %v638_v29 = vadd.s32 4294967280, %v624_v26 }
 0x110   : > { %v240_v2 = vpop.permute.xlu1 %239 }
 0x111   : > { %v242_v34 = vadd.f32 %v240_v2, %v199_v30 }
 0x114   : > { %v251_v3 = vpop.permute.xlu0 %250  ;;  %v262_v4 = vpop.permute.xlu1 %261 }
 0x115   : > { %v264_v53 = vadd.f32 %v262_v4, %v213_v49  ;;  %v253_v20 = vadd.f32 %v251_v3, %v206_v50 }
 0x118   : > { %v295_v6 = vpop.permute.xlu1 %294 }
 0x119   : > { %v284_v5 = vpop.permute.xlu0 %283  ;;  %v297_v35 = vadd.f32 %v295_v6, %v242_v34  ;;  %v645_v34 = vadd.s32 4294967272, %v624_v26 }
 0x11a   : > { %v286_v37 = vadd.f32 %v284_v5, %v231_v33 }
 0x11e   : > { %v273_v7 = vpop.permute.xlu0 %272 }
 0x11f   : > { %v275_v62 = vadd.f32 %v273_v7, %v220_v55 }
 0x122   : > { %v317_v9 = vpop.permute.xlu0 %316 }
 0x123   : > { %v306_v8 = vpop.permute.xlu1 %305  ;;  %v319_v15 = vadd.f32 %v317_v9, %v264_v53 }
 0x124   : > { %v308_v59 = vadd.f32 %v306_v8, %v253_v20 }
 0x126   : > { %v350_v11 = vpop.permute.xlu0 %349 }
 0x127   : > { %v352_v38 = vadd.f32 %v350_v11, %v297_v35 }
 0x128   : > { %v339_v10 = vpop.permute.xlu1 %338 }
 0x129   : > { %v341_v42 = vadd.f32 %v339_v10, %v286_v37 }
 0x12d   : > { %v328_v12 = vpop.permute.xlu1 %327 }
 0x12e   : > { %v330_v2 = vadd.f32 %v328_v12, %v275_v62 }
 0x131   : > { %v372_v14 = vpop.permute.xlu1 %371 }
 0x132   : > { %v361_v13 = vpop.permute.xlu0 %360  ;;  %v374_v61 = vadd.f32 %v372_v14, %v319_v15 }
 0x133   : > { %v363_v63 = vadd.f32 %v361_v13, %v308_v59 }
 0x135   : > { %v405_v18 = vpop.permute.xlu1 %404 }
 0x136   : > { %v407_v43 = vadd.f32 %v405_v18, %v352_v38 }
 0x137   : > { %v394_v17 = vpop.permute.xlu0 %393 }
 0x138   : > { %v396_v46 = vadd.f32 %v394_v17, %v341_v42 }
 0x13c   : > { %v383_v19 = vpop.permute.xlu0 %382 }
 0x13d   : > { %v385_v6 = vadd.f32 %v383_v19, %v330_v2 }
 0x140   : > { %v427_v22 = vpop.permute.xlu0 %426 }
 0x141   : > { %v416_v21 = vpop.permute.xlu1 %415  ;;  %v429_v1 = vadd.f32 %v427_v22, %v374_v61 }
 0x142   : > { %v418_v4 = vadd.f32 %v416_v21, %v363_v63 }
 0x144   : > { %v460_v24 = vpop.permute.xlu0 %459 }
 0x145   : > { %v462_v47 = vadd.f32 %v460_v24, %v407_v43 }
 0x146   : > { %v449_v23 = vpop.permute.xlu1 %448 }
 0x147   : > { %v451_v51 = vadd.f32 %v449_v23, %v396_v46 }
 0x14b   : > { %v438_v27 = vpop.permute.xlu1 %437 }
 0x14c   : > { %v440_v11 = vadd.f32 %v438_v27, %v385_v6  ;;  %v626_v27 = vshrl.u32 %v623_v25, 7 }
 0x14e   : > { %v627_v30 = vsub.s32 %v624_v26, %v626_v27  ;;  %v641_v35 = vsub.s32 %v638_v29, %v626_v27 }
 0x14f   : > { %v482_v31 = vpop.permute.xlu1 %481 }
 0x150   : > { %v471_v28 = vpop.permute.xlu0 %470  ;;  %v484_v3 = vadd.f32 %v482_v31, %v429_v1 }
 0x151   : > { %v473_v10 = vadd.f32 %v471_v28, %v418_v4  ;;  %v631_v28 = vadd.s32 4294967288, %v624_v26 }
 0x153   : > { %v515_v39 = vpop.permute.xlu1 %514 }
 0x154   : > { %v517_v52 = vadd.f32 %v515_v39, %v462_v47  ;;  %v648_v39 = vsub.s32 %v645_v34, %v626_v27 }
 0x155   : > { %v504_v32 = vpop.permute.xlu0 %503 }
 0x156   : > { %v506_v56 = vadd.f32 %v504_v32, %v451_v51  ;;  %v634_v32 = vsub.s32 %v631_v28, %v626_v27 }
 0x15a   : > { %v493_v36 = vpop.permute.xlu0 %492 }
 0x15b   : > { %v495_v14 = vadd.f32 %v493_v36, %v440_v11  ;;  %v652_v36 = vadd.s32 4294967264, %v624_v26 }
 0x15d   : > { %v655_v43 = vsub.s32 %v652_v36, %v626_v27 }
 0x15e   : > { %v537_v44 = vpop.permute.xlu0 %536 }
 0x15f   : > { %v526_v48 = vpop.permute.xlu1 %525  ;;  %v539_v9 = vadd.f32 %v537_v44, %v484_v3 }
 0x160   : > { %v528_v8 = vadd.f32 %v526_v48, %v473_v10 }
 0x162   : > { %v570_v54 = vpop.permute.xlu0 %569 }
 0x163   : > { %v572_v57 = vadd.f32 %v570_v54, %v517_v52 }
 0x164   : > { %v559_v58 = vpop.permute.xlu1 %558 }
 0x165   : > { %v561_v60 = vadd.f32 %v559_v58, %v506_v56  ;;  %v610_v16 = vsel %vm606_vm1, %v572_v57, inf }
 0x166   : > { %611 = vmin.xlane.f32.xlu0 %v610_v16 }
 0x167   : > { %v607_v0 = vsel %vm606_vm1, %v561_v60, inf }
 0x168   : > { %608 = vmin.xlane.f32.xlu1 %v607_v0 }
 0x169   : > { %v548_v5 = vpop.permute.xlu1 %547 }
 0x16a   : > { %v550_v13 = vadd.f32 %v548_v5, %v495_v14 }
 0x16d   : > { %v592_v17 = vpop.permute.xlu1 %591 }
 0x16e   : > { %v594_v18 = vadd.f32 %v592_v17, %v539_v9  ;;  %v581_v23 = vpop.permute.xlu0 %580 }
 0x16f   : > { %v583_v24 = vadd.f32 %v581_v23, %v528_v8 }
 0x170   : > { %v616_v7 = vsel %vm606_vm1, %v594_v18, inf }
 0x171   : > { %617 = vmin.xlane.f32.xlu1 %v616_v7  ;;  %v613_v22 = vsel %vm606_vm1, %v583_v24, inf }
 0x172   : > { %v603_v12 = vpop.permute.xlu0 %602  ;;  %614 = vmin.xlane.f32.xlu0 %v613_v22 }
 0x173   : > { %v605_v21 = vadd.f32 %v603_v12, %v550_v13 }
 0x175   : > { %v619_v19 = vsel %vm606_vm1, %v605_v21, inf }
 0x176   : > { %620 = vmin.xlane.f32.xlu0 %v619_v19 }
 0x1f3   : > { %v612_v33 = vpop.xlane.xlu0 %611 }
 0x1f4   : > { %v635_v38 = vrot.slane %v612_v33, %v634_v32 }
 0x1f5   : > { %v609_v31 = vpop.xlane.xlu1 %608 }
 0x1f6   : > { %v628_v37 = vrot.slane %v609_v31, %v627_v30 }
 0x1f8   : > { %v659_v44 = vsel %vm658_vm2, %v628_v37, %v635_v38 }
 0x1fe   : > { %v618_v41 = vpop.xlane.xlu1 %617 }
 0x1ff   : > { %v615_v40 = vpop.xlane.xlu0 %614  ;;  %v649_v46 = vrot.slane %v618_v41, %v648_v39 }
 0x200   : > { %v642_v42 = vrot.slane %v615_v40, %v641_v35 }
 0x202   : > { %v661_v45 = vsel %vm660_vm3, %v659_v44, %v642_v42 }
 0x203   : > { %v621_v47 = vpop.xlane.xlu0 %620  ;;  %v663_v49 = vsel %vm662_vm4, %v661_v45, %v649_v46 }
 0x204   : > { %v656_v48 = vrot.slane %v621_v47, %v655_v43 }
 0x206   : > { %v665_v50 = vsel %vm664_vm5, %v663_v49, %v656_v48 }
 0x207   : > { %v666_v51 = vmul.f32 0.125, %v665_v50 }
 0x209   : > { %v667_v52 = vmul.f32 %v666_v51, %v666_v51  ;;  %673 = vst.msk [vmem:[%s170_s30] sm:$0x1] %vm671_vm6, %v666_v51 }
 0x20a   : > { %899 = shalt.err (!%p896_p3)
}
 0x20b   : > { %s900_s19 = scalar_lea.hbm %s1195_s7, 16  ;;  %s904_s25 = scalar_lea.hbm %s1275_s3, 32 }
 0x20c   : > { %p901_p4 = scmp.ne.s32.totalorder %s1195_s7, %s900_s19  ;;  %p905_p9 = scmp.lt.u32.totalorder %s1195_s7, %s1275_s3 }
 0x20d   : > { %p906_p10 = scmp.lt.u32.totalorder %s904_s25, %s900_s19  ;;  %p908_p12 = scmp.lt.u32.totalorder %s900_s19, %s1195_s7 }
 0x20e   : > { %p902_p7 = pnand %p901_p4, %p1057_p5 }
 0x20f   : > { %p907_p11 = por %p906_p10, %p905_p9 }
 0x210   : > { %p903_p8 = pneg %p902_p7 }
 0x211   : > { %p909_p13 = por %p908_p12, %p907_p11 }
 0x213   : > { %p910_p0 = pnand %p909_p13, %p903_p8 }
 0x215   : > { %913 = shalt.err (!%p910_p0)
}
 0x216   : > { %797 = dma.vmem_to_hbm [thread:$0]  (%p1057_p5), %s1197_s4, 16, %s1195_s7, %s679_s8   ;;  %v668_v53 = vsub.f32 0.0, %v667_v52 }
 0x217   : > { %s164_s30 = scalar_lea.vmem [#allocation2], %s1186_s28  ;;  %s1228_s10 = scalar_lea.hbm %s1274_s2, %s792_s29 }
 0x218   : > { %v669_v54 = vmul.f32 1.442695, %v668_v53  ;;  %s691_s5 = sshll.u32 %s164_s30, 4  ;;  %s675_s4 = scalar_lea.sflag [#allocation3], %s1186_s28  ;;  %s1230_s5 = int_to_ptr.vmem [resolvable:$true] %s691_s5 }
 0x219   : > { %s914_s7 = scalar_lea.vmem %s1230_s5, 16  ;;  %s998_s16 = smov [#allocation2]  }
 0x21a   : > { %884 = vpow2.f32 %v669_v54  ;;  %p915_p1 = scmp.ne.s32.totalorder %s1230_s5, %s914_s7  ;;  %s918_s8 = sshll.u32 %s998_s16, 4  ;;  %s919_s8 = int_to_ptr.vmem [resolvable:$false] %s918_s8 }
 0x21b   : > { %s920_s11 = scalar_lea.vmem %s919_s8, 32  ;;  %p921_p4 = scmp.lt.s32.totalorder %s1230_s5, %s919_s8 }
 0x21c   : > { %p916_p2 = pnand %p915_p1, %p1057_p5  ;;  %p922_p7 = scmp.lt.s32.totalorder %s920_s11, %s914_s7 }
 0x21e   : > { %p917_p3 = pneg %p916_p2  ;;  %p923_p8 = por %p922_p7, %p921_p4 }
 0x220   : > { %p924_p9 = pnand %p923_p8, %p917_p3 }
 0x224   : > { %v885_v55 = vpop.eup %884 }
 0x225   : > { %672 = vst.msk [vmem:[%s164_s30] sm:$0x1] %vm671_vm6, %v885_v55 }
 0x226   : > { %927 = shalt.err (!%p924_p9)
}
 0x227   : > { %s928_s28 = scalar_lea.hbm %s1228_s10, 16  ;;  %s932_s19 = scalar_lea.hbm %s1274_s2, 32 }
 0x228   : > { %p929_p10 = scmp.ne.s32.totalorder %s1228_s10, %s928_s28  ;;  %p933_p13 = scmp.lt.u32.totalorder %s1228_s10, %s1274_s2 }
 0x229   : > { %p934_p0 = scmp.lt.u32.totalorder %s932_s19, %s928_s28  ;;  %p936_p2 = scmp.lt.u32.totalorder %s928_s28, %s1228_s10 }
 0x22a   : > { %p930_p11 = pnand %p929_p10, %p1057_p5 }
 0x22b   : > { %p935_p1 = por %p934_p0, %p933_p13 }
 0x22c   : > { %p931_p12 = pneg %p930_p11 }
 0x22d   : > { %p937_p3 = por %p936_p2, %p935_p1 }
 0x22f   : > { %p938_p4 = pnand %p937_p3, %p931_p12 }
 0x231   : > { %941 = shalt.err (!%p938_p4)
}
 0x232   : > { %796 = dma.vmem_to_hbm [thread:$0]  (%p1057_p5), %s1230_s5, 16, %s1228_s10, %s675_s4  }
 0x233 PF: > { %p807_p7 = scmp.ge.s32.totalorder %s980_s15, 2  ;;  %s716_s25 = sand.u32 1, %s968_s12  }
 0x234   : > { %s717_s26 = scalar_lea.sflag [#allocation3], %s716_s25 }
 0x235   : > { %p801_p8 = pnand %p807_p7, %p1061_p6 }
 0x237   : > { %959 = dma.done.wait (!%p801_p8), %s717_s26, 16  }
 0x238   : > { %961 = vsyncadd (!%p801_p8), %s717_s26, 4294967280  ;;  %s725_s27 = scalar_lea.sflag [#allocation5], %s716_s25 }
 0x239   : > { %963 = dma.done.wait (!%p801_p8), %s725_s27, 16  }
 0x23a   : > { %965 = vsyncadd (!%p801_p8), %s725_s27, 4294967280  ;;  %p17_p5 = scmp.ge.s32.totalorder %s1044_s18, 4   ;;  %s1278_s12 = smov %s972_s13 }
 0x23b   : > { %s1279_s13 = smov %s976_s14  ;;  %s1280_s14 = smov %s1055_s21 }
 0x23c   : > { %s1281_s15 = smov %s1044_s18  ;;  %19 = sbr.rel (!%p17_p5) target bundleno = 5 (0x5), region = 80 }
 0x243   :  { %729 = vsyncpa [#allocation3], 1 }
 0x244   :  { %731 = vsyncpa [#allocation3 + $0x1], 1 }
 0x245   :  { %732 = vsyncpa [#allocation5], 1 }
 0x246   :  { %734 = vsyncpa [#allocation5 + $0x1], 1 }

</bundles_post_ra>
